<compile_context>
chip_gen: v7x
topology: tpu7x:2x2x1
jax: 0.10.0
libtpu: 0.0.40
codegen_flags: <defaults>
</compile_context>

<pallas_src>
import functools

import jax
import jax.numpy as jnp
from jax.experimental import pallas as pl
from jax.experimental.pallas import tpu as pltpu


def _round_up(x, m):
    return ((x + m - 1) // m) * m


def _conv3d_block_kernel(x_ref, w_ref, scale_ref, bias_ref, o_ref, acc_ref, *,
                         kernel_hw, Wp, use_relu):
    """One grid step = (batch n, output plane d, depth tap kd).

    x_ref     : (Cin_p, PL_in)   bf16 padded input plane d+kd, spatial in lanes
    w_ref     : (kD, Cout, Kkd)  bf16 resident weights, Kkd = kH*kW*Cin_p
    scale_ref : (Cout, 1) f32    folded BatchNorm scale
    bias_ref  : (Cout, 1) f32    folded BatchNorm / conv bias
    o_ref     : (Cout, PL_out)   lane-dense output plane (128-multiple lanes)
    acc_ref   : (Cout, PL_out)   f32 accumulator across the kd grid axis
    """
    kH, kW = kernel_hw
    kd = pl.program_id(2)
    L = o_ref.shape[-1]
    cin_p = x_ref.shape[0]

    @pl.when(kd == 0)
    def _():
        acc_ref[...] = jnp.zeros_like(acc_ref)

    xt = x_ref[...]                                    # (Cin_p, PL_in) bf16
    # In-plane im2col: 9 static lane-shifted slices, stacked on a leading axis
    # and collapsed with a layout-trivial reshape (whole bf16 sublane groups).
    taps = []
    for kh in range(kH):
        for kw in range(kW):
            shift = kh * Wp + kw                       # static lane shift
            taps.append(xt[:, shift:shift + L])        # (Cin_p, L) bf16
    patch = jnp.stack(taps, axis=0).reshape(kH * kW * cin_p, L)   # (Kkd, L)

    wk = w_ref[kd]                                     # (Cout, Kkd) bf16
    acc_ref[...] += jnp.dot(wk, patch,
                            preferred_element_type=jnp.float32)   # MXU, f32 acc

    @pl.when(kd == pl.num_programs(2) - 1)
    def _():
        out = acc_ref[...] * scale_ref[...] + bias_ref[...]        # folded BN
        if use_relu:
            out = jnp.maximum(out, 0.0)
        o_ref[...] = out.astype(o_ref.dtype)           # unmasked lane-dense store


def conv3d_block(x_ncdhw, weight_oidhw, conv_bias, bn_gamma, bn_beta,
                 bn_mean, bn_var, *, stride=(1, 1, 1), padding=(0, 0, 0),
                 eps=1e-5, use_bn=True, use_relu=True, out_dtype=None):
    """Forward pass of Conv3dBlock. Input/output in PyTorch NCDHW layout."""
    N, Cin, D, H, W = x_ncdhw.shape
    Cout, _, kD, kH, kW = weight_oidhw.shape
    sd, sh, sw = stride
    pd, ph, pw = padding
    out_dtype = x_ncdhw.dtype if out_dtype is None else out_dtype

    Dp, Hp, Wp = D + 2 * pd, H + 2 * ph, W + 2 * pw
    Dout = (Dp - kD) // sd + 1
    Hout = (Hp - kH) // sh + 1
    Wout = (Wp - kW) // sw + 1
    Dfull = Dp - kD + 1                      # stride-1 output planes

    # 128-lane-aligned flattened plane lengths.  The output plane carries the
    # full Hp*Wp stride-1 grid (garbage positions cropped by the wrapper); the
    # input plane carries an extra zero tail so every in-plane tap slice stays
    # in bounds.
    PL_out = _round_up(Hp * Wp, 128)
    tail = (kH - 1) * Wp + (kW - 1)
    PL_in = _round_up(PL_out + tail, 128)

    # bf16 sublane tile is 16 rows -> pad Cin to a multiple of 16.
    Cin_p = _round_up(Cin, 16)
    Kkd = kH * kW * Cin_p

    # ---- layout plumbing (XLA glue; fuses into ~one copy of the activation) --
    xb = x_ncdhw.astype(jnp.bfloat16)                      # bf16 before padding
    xb = jnp.transpose(xb, (0, 2, 1, 3, 4))                # (N, D, Cin, H, W)
    xb = jnp.pad(xb, ((0, 0), (pd, pd), (0, Cin_p - Cin), (ph, ph), (pw, pw)))
    xb = xb.reshape(N, Dp, Cin_p, Hp * Wp)
    xb = jnp.pad(xb, ((0, 0), (0, 0), (0, 0), (0, PL_in - Hp * Wp)))
    # xb: (N, Dp, Cin_p, PL_in) bf16

    # Weight -> (kD, Cout, Kkd) with Kkd ordered (kh, kw, cin); bf16 for MXU.
    wpad = jnp.pad(weight_oidhw,
                   ((0, 0), (0, Cin_p - Cin), (0, 0), (0, 0), (0, 0)))
    w3 = jnp.transpose(wpad, (2, 0, 3, 4, 1)).reshape(kD, Cout, Kkd)
    w3 = w3.astype(jnp.bfloat16)

    # Fold BatchNorm (inference running stats) and conv bias into scale/bias.
    if use_bn:
        scale = (bn_gamma / jnp.sqrt(bn_var + eps)).astype(jnp.float32)
        bias = (bn_beta - bn_mean * scale).astype(jnp.float32)
    else:
        scale = jnp.ones((Cout,), jnp.float32)
        bias = jnp.zeros((Cout,), jnp.float32)
    if conv_bias is not None:
        bias = bias + conv_bias.astype(jnp.float32) * scale
    scale = scale.reshape(Cout, 1)
    bias = bias.reshape(Cout, 1)

    kernel = functools.partial(
        _conv3d_block_kernel,
        kernel_hw=(kH, kW),
        Wp=Wp,
        use_relu=use_relu)

    flops = 2 * N * Dfull * kD * Cout * Kkd * PL_out
    bytes_accessed = (N * Dfull * kD * Cin_p * PL_in * 2    # input planes (per kd)
                      + kD * Cout * Kkd * 2                  # resident weights
                      + N * Dfull * Cout * PL_out * jnp.dtype(out_dtype).itemsize)

    # Per-step VMEM: input plane + 9-tap patch + f32 acc + output plane — a few
    # KiB here, ~1-2 MiB at production I3D shapes, well under every
    # generation's scoped-VMEM default, so no vmem_limit_bytes override.
    out_flat = pl.pallas_call(
        kernel,
        out_shape=jax.ShapeDtypeStruct((N, Dfull, Cout, PL_out), out_dtype),
        grid_spec=pltpu.PrefetchScalarGridSpec(
            num_scalar_prefetch=0,
            grid=(N, Dfull, kD),
            in_specs=[
                # One padded input plane (d + kd) per step.
                pl.BlockSpec((pl.Squeezed(), pl.Squeezed(), Cin_p, PL_in),
                             lambda n, d, kd: (n, d + kd, 0, 0)),
                # Grid-invariant operands: constant index_map -> fetched once.
                pl.BlockSpec((kD, Cout, Kkd), lambda n, d, kd: (0, 0, 0)),
                pl.BlockSpec((Cout, 1), lambda n, d, kd: (0, 0)),
                pl.BlockSpec((Cout, 1), lambda n, d, kd: (0, 0)),
            ],
            out_specs=pl.BlockSpec((pl.Squeezed(), pl.Squeezed(), Cout, PL_out),
                                   lambda n, d, kd: (n, d, 0, 0)),
            scratch_shapes=[pltpu.VMEM((Cout, PL_out), jnp.float32)]),
        compiler_params=pltpu.CompilerParams(
            dimension_semantics=("parallel", "parallel", "arbitrary")),
        cost_estimate=pl.CostEstimate(flops=flops, transcendentals=0,
                                      bytes_accessed=bytes_accessed),
    )(xb, w3, scale, bias)

    # (N, Dfull, Cout, PL_out) -> crop lane padding -> NCDHW -> stride/crop.
    out = out_flat[..., :Hp * Wp].reshape(N, Dfull, Cout, Hp, Wp)
    out = jnp.transpose(out, (0, 2, 1, 3, 4))
    out = out[:, :, ::sd, ::sh, ::sw][:, :, :Dout, :Hout, :Wout]
    return out


def _reference(x_ncdhw, weight_oidhw, conv_bias, bn_gamma, bn_beta,
               bn_mean, bn_var, *, stride, padding, eps=1e-5,
               use_bn=True, use_relu=True):
    pd, ph, pw = padding
    out = jax.lax.conv_general_dilated(
        x_ncdhw, weight_oidhw,
        window_strides=stride,
        padding=[(pd, pd), (ph, ph), (pw, pw)],
        dimension_numbers=("NCDHW", "OIDHW", "NCDHW"))
    if conv_bias is not None:
        out = out + conv_bias[None, :, None, None, None]
    if use_bn:
        inv = 1.0 / jnp.sqrt(bn_var + eps)
        out = ((out - bn_mean[None, :, None, None, None])
               * inv[None, :, None, None, None]
               * bn_gamma[None, :, None, None, None]
               + bn_beta[None, :, None, None, None])
    if use_relu:
        out = jnp.maximum(out, 0.0)
    return out


if __name__ == "__main__":
    # Conv3dBlock(in_channels=4, out_channels=8, kernel_size=(3,3,3),
    #             padding=(1,1,1), stride=(1,1,1), use_bias=False,
    #             use_bn=True, use_relu=True)
    N, Cin, Cout = 2, 4, 8
    D, H, W = 4, 8, 8
    ksize = (3, 3, 3)
    stride = (1, 1, 1)
    padding = (1, 1, 1)

    key = jax.random.PRNGKey(0)
    kx, kw, kg, kb, km, kv = jax.random.split(key, 6)

    x = jax.random.normal(kx, (N, Cin, D, H, W), jnp.float32)
    weight = jax.random.normal(kw, (Cout, Cin) + ksize, jnp.float32) * 0.1
    conv_bias = None  # use_bias=False
    bn_gamma = jax.random.normal(kg, (Cout,), jnp.float32) * 0.1 + 1.0
    bn_beta = jax.random.normal(kb, (Cout,), jnp.float32) * 0.1
    bn_mean = jax.random.normal(km, (Cout,), jnp.float32) * 0.1
    bn_var = jax.random.uniform(kv, (Cout,), jnp.float32, 0.5, 1.5)

    out = conv3d_block(x, weight, conv_bias, bn_gamma, bn_beta, bn_mean,
                       bn_var, stride=stride, padding=padding)
    out = jax.block_until_ready(out)
    assert out.shape == (N, Cout, D, H, W), out.shape

    # Full-f32 module reference (true eval-mode semantics).
    ref = _reference(x, weight, conv_bias, bn_gamma, bn_beta, bn_mean, bn_var,
                     stride=stride, padding=padding)
    # Reference with bf16-quantized matmul inputs (what the MXU consumes).
    x_q = x.astype(jnp.bfloat16).astype(jnp.float32)
    w_q = weight.astype(jnp.bfloat16).astype(jnp.float32)
    ref_q = _reference(x_q, w_q, conv_bias, bn_gamma, bn_beta, bn_mean,
                       bn_var, stride=stride, padding=padding)

    err_q = float(jnp.max(jnp.abs(out - ref_q)))
    err_f32 = float(jnp.max(jnp.abs(out - ref)))
    assert err_q < 2e-3, err_q      # kernel vs bf16-input reference (tight)
    assert err_f32 < 1e-1, err_f32  # bf16 quantization vs full-f32 module
    print("KERNEL_OK")
</pallas_src>

<mosaic_0001>
module attributes {stable_mosaic.version = 11 : i64} {
  func.func @_conv3d_block_kernel(%arg0: i32, %arg1: i32, %arg2: i32, %arg3: memref<1x1x16x256xbf16, #tpu.memory_space<vmem>>, %arg4: memref<3x8x144xbf16, #tpu.memory_space<vmem>>, %arg5: memref<8x1xf32, #tpu.memory_space<vmem>>, %arg6: memref<8x1xf32, #tpu.memory_space<vmem>>, %arg7: memref<1x1x8x128xf32, #tpu.memory_space<vmem>>, %arg8: memref<8x128xf32, #tpu.memory_space<vmem>>) attributes {dimension_semantics = [#tpu.dimension_semantics<parallel>, #tpu.dimension_semantics<parallel>, #tpu.dimension_semantics<arbitrary>], iteration_bounds = array<i64: 2, 4, 3>, scalar_prefetch = 0 : i64, scratch_operands = 1 : i64, tpu.core_type = #tpu.core_type<tc>, window_params = [{transform_indices = @transform_0, window_bounds = array<i64: 1, 1, 16, 256>}, {pipeline_mode = #tpu.pipeline_mode<synchronous>, transform_indices = @transform_1, window_bounds = array<i64: 3, 8, 144>}, {pipeline_mode = #tpu.pipeline_mode<synchronous>, transform_indices = @transform_2, window_bounds = array<i64: 8, 1>}, {pipeline_mode = #tpu.pipeline_mode<synchronous>, transform_indices = @transform_3, window_bounds = array<i64: 8, 1>}, {transform_indices = @transform_4, window_bounds = array<i64: 1, 1, 8, 128>}]} {
    %c0_i32 = arith.constant 0 : i32
    %0 = arith.cmpi eq, %arg2, %c0_i32 : i32
    %1 = arith.extui %0 : i1 to i32
    %c0_i32_0 = arith.constant 0 : i32
    %2 = arith.cmpi ne, %1, %c0_i32_0 : i32
    scf.if %2 {
      %cst_11 = arith.constant 0.000000e+00 : f32
      %35 = vector.broadcast %cst_11 : f32 to vector<8x128xf32>
      %c0_12 = arith.constant 0 : index
      %c0_13 = arith.constant 0 : index
      %36 = vector.load %arg8[%c0_12, %c0_13] : memref<8x128xf32, #tpu.memory_space<vmem>>, vector<8x128xf32>
      tpu.vector_store %arg8[%c0_12, %c0_13], %35 {strides = array<i32>} : memref<8x128xf32, #tpu.memory_space<vmem>>, vector<8x128xf32>,
    } else {
    }
    %c0 = arith.constant 0 : index
    %c0_1 = arith.constant 0 : index
    %c0_2 = arith.constant 0 : index
    %c0_3 = arith.constant 0 : index
    %3 = vector.load %arg3[%c0, %c0_1, %c0_2, %c0_3] : memref<1x1x16x256xbf16, #tpu.memory_space<vmem>>, vector<1x1x16x256xbf16>
    %4 = vector.shape_cast %3 : vector<1x1x16x256xbf16> to vector<16x256xbf16>
    %5 = vector.extract_strided_slice %4 {offsets = [0, 0], sizes = [16, 128], strides = [1, 1]} : vector<16x256xbf16> to vector<16x128xbf16>
    %6 = vector.extract_strided_slice %4 {offsets = [0, 1], sizes = [16, 128], strides = [1, 1]} : vector<16x256xbf16> to vector<16x128xbf16>
    %7 = vector.extract_strided_slice %4 {offsets = [0, 2], sizes = [16, 128], strides = [1, 1]} : vector<16x256xbf16> to vector<16x128xbf16>
    %8 = vector.extract_strided_slice %4 {offsets = [0, 10], sizes = [16, 128], strides = [1, 1]} : vector<16x256xbf16> to vector<16x128xbf16>
    %9 = vector.extract_strided_slice %4 {offsets = [0, 11], sizes = [16, 128], strides = [1, 1]} : vector<16x256xbf16> to vector<16x128xbf16>
    %10 = vector.extract_strided_slice %4 {offsets = [0, 12], sizes = [16, 128], strides = [1, 1]} : vector<16x256xbf16> to vector<16x128xbf16>
    %11 = vector.extract_strided_slice %4 {offsets = [0, 20], sizes = [16, 128], strides = [1, 1]} : vector<16x256xbf16> to vector<16x128xbf16>
    %12 = vector.extract_strided_slice %4 {offsets = [0, 21], sizes = [16, 128], strides = [1, 1]} : vector<16x256xbf16> to vector<16x128xbf16>
    %13 = vector.extract_strided_slice %4 {offsets = [0, 22], sizes = [16, 128], strides = [1, 1]} : vector<16x256xbf16> to vector<16x128xbf16>
    %14 = vector.shape_cast %5 : vector<16x128xbf16> to vector<1x16x128xbf16>
    %15 = vector.shape_cast %6 : vector<16x128xbf16> to vector<1x16x128xbf16>
    %16 = vector.shape_cast %7 : vector<16x128xbf16> to vector<1x16x128xbf16>
    %17 = vector.shape_cast %8 : vector<16x128xbf16> to vector<1x16x128xbf16>
    %18 = vector.shape_cast %9 : vector<16x128xbf16> to vector<1x16x128xbf16>
    %19 = vector.shape_cast %10 : vector<16x128xbf16> to vector<1x16x128xbf16>
    %20 = vector.shape_cast %11 : vector<16x128xbf16> to vector<1x16x128xbf16>
    %21 = vector.shape_cast %12 : vector<16x128xbf16> to vector<1x16x128xbf16>
    %22 = vector.shape_cast %13 : vector<16x128xbf16> to vector<1x16x128xbf16>
    %23 = tpu.concatenate %14, %15, %16, %17, %18, %19, %20, %21, %22 in 0 : vector<1x16x128xbf16>, vector<1x16x128xbf16>, vector<1x16x128xbf16>, vector<1x16x128xbf16>, vector<1x16x128xbf16>, vector<1x16x128xbf16>, vector<1x16x128xbf16>, vector<1x16x128xbf16>, vector<1x16x128xbf16> -> vector<9x16x128xbf16>
    %24 = vector.shape_cast %23 : vector<9x16x128xbf16> to vector<144x128xbf16>
    %25 = arith.index_cast %arg2 : i32 to index
    %c0_4 = arith.constant 0 : index
    %c0_5 = arith.constant 0 : index
    %26 = vector.load %arg4[%25, %c0_4, %c0_5] : memref<3x8x144xbf16, #tpu.memory_space<vmem>>, vector<1x8x144xbf16>
    %27 = vector.shape_cast %26 : vector<1x8x144xbf16> to vector<8x144xbf16>
    %c0_6 = arith.constant 0 : index
    %c0_7 = arith.constant 0 : index
    %28 = vector.load %arg8[%c0_6, %c0_7] : memref<8x128xf32, #tpu.memory_space<vmem>>, vector<8x128xf32>
    %cst = arith.constant dense<0.000000e+00> : vector<8x128xf32>
    %29 = tpu.matmul %27, %24, %cst {dimension_numbers = #tpu.dot_dimension_numbers<[1], [0], [0], [1], [0, 0, 1, 1], [], []>} : vector<8x144xbf16>, vector<144x128xbf16>, vector<8x128xf32> -> vector<8x128xf32>
    %30 = arith.addf %28, %29 : vector<8x128xf32>
    %c0_8 = arith.constant 0 : index
    %c0_9 = arith.constant 0 : index
    %31 = vector.load %arg8[%c0_8, %c0_9] : memref<8x128xf32, #tpu.memory_space<vmem>>, vector<8x128xf32>
    tpu.vector_store %arg8[%c0_8, %c0_9], %30 {strides = array<i32>} : memref<8x128xf32, #tpu.memory_space<vmem>>, vector<8x128xf32>,
    %c2_i32 = arith.constant 2 : i32
    %32 = arith.cmpi eq, %arg2, %c2_i32 : i32
    %33 = arith.extui %32 : i1 to i32
    %c0_i32_10 = arith.constant 0 : i32
    %34 = arith.cmpi ne, %33, %c0_i32_10 : i32
    scf.if %34 {
      %c0_11 = arith.constant 0 : index
      %c0_12 = arith.constant 0 : index
      %35 = vector.load %arg8[%c0_11, %c0_12] : memref<8x128xf32, #tpu.memory_space<vmem>>, vector<8x128xf32>
      %c0_13 = arith.constant 0 : index
      %c0_14 = arith.constant 0 : index
      %36 = vector.load %arg5[%c0_13, %c0_14] : memref<8x1xf32, #tpu.memory_space<vmem>>, vector<8x1xf32>
      %37 = vector.broadcast %36 : vector<8x1xf32> to vector<8x128xf32>
      %38 = arith.mulf %35, %37 : vector<8x128xf32>
      %c0_15 = arith.constant 0 : index
      %c0_16 = arith.constant 0 : index
      %39 = vector.load %arg6[%c0_15, %c0_16] : memref<8x1xf32, #tpu.memory_space<vmem>>, vector<8x1xf32>
      %40 = vector.broadcast %39 : vector<8x1xf32> to vector<8x128xf32>
      %41 = arith.addf %38, %40 : vector<8x128xf32>
      %cst_17 = arith.constant 0.000000e+00 : f32
      %42 = vector.broadcast %cst_17 : f32 to vector<8x128xf32>
      %43 = arith.maximumf %41, %42 : vector<8x128xf32>
      %c0_18 = arith.constant 0 : index
      %c0_19 = arith.constant 0 : index
      %c0_20 = arith.constant 0 : index
      %c0_21 = arith.constant 0 : index
      %44 = vector.load %arg7[%c0_18, %c0_19, %c0_20, %c0_21] : memref<1x1x8x128xf32, #tpu.memory_space<vmem>>, vector<1x1x8x128xf32>
      %45 = vector.shape_cast %44 : vector<1x1x8x128xf32> to vector<8x128xf32>
      %46 = vector.shape_cast %43 : vector<8x128xf32> to vector<1x1x8x128xf32>
      tpu.vector_store %arg7[%c0_18, %c0_19, %c0_20, %c0_21], %46 {strides = array<i32>} : memref<1x1x8x128xf32, #tpu.memory_space<vmem>>, vector<1x1x8x128xf32>,
    } else {
    }
    return
  }
  func.func @transform_0(%arg0: i32, %arg1: i32, %arg2: i32) -> (i32, i32, i32, i32) {
    %0 = arith.addi %arg1, %arg2 : i32
    %c0_i32 = arith.constant 0 : i32
    %c0_i32_0 = arith.constant 0 : i32
    %c0_i32_1 = arith.constant 0 : i32
    return %arg0, %0, %c0_i32, %c0_i32_0 : i32, i32, i32, i32
  }
  func.func @transform_1(%arg0: i32, %arg1: i32, %arg2: i32) -> (i32, i32, i32) {
    %c0_i32 = arith.constant 0 : i32
    %c0_i32_0 = arith.constant 0 : i32
    %c0_i32_1 = arith.constant 0 : i32
    %c0_i32_2 = arith.constant 0 : i32
    return %c0_i32, %c0_i32_0, %c0_i32_1 : i32, i32, i32
  }
  func.func @transform_2(%arg0: i32, %arg1: i32, %arg2: i32) -> (i32, i32) {
    %c0_i32 = arith.constant 0 : i32
    %c0_i32_0 = arith.constant 0 : i32
    %c0_i32_1 = arith.constant 0 : i32
    return %c0_i32, %c0_i32_0 : i32, i32
  }
  func.func @transform_3(%arg0: i32, %arg1: i32, %arg2: i32) -> (i32, i32) {
    %c0_i32 = arith.constant 0 : i32
    %c0_i32_0 = arith.constant 0 : i32
    %c0_i32_1 = arith.constant 0 : i32
    return %c0_i32, %c0_i32_0 : i32, i32
  }
  func.func @transform_4(%arg0: i32, %arg1: i32, %arg2: i32) -> (i32, i32, i32, i32) {
    %c0_i32 = arith.constant 0 : i32
    %c0_i32_0 = arith.constant 0 : i32
    %c0_i32_1 = arith.constant 0 : i32
    return %arg0, %arg1, %c0_i32, %c0_i32_0 : i32, i32, i32, i32
  }
}

</mosaic_0001>

<bundles_post_ra>
// kernel: tpu_custom_call.1
= control target key start
LH: loop header
LB: loop body
LE: loop exit
PB: predicated region body
PF: predicated region fallthrough
CT: control target
= control target key end

     0   :  { %s1328_s0 = inlined_call_operand.hbm [shape: bf16[2,6,16,256], index: 0, kind: input, shape index: {}]   ;;  %s1329_s1 = inlined_call_operand.hbm [shape: bf16[3,8,144], index: 1, kind: input, shape index: {}]   ;;  %s1330_s2 = inlined_call_operand.vmem [shape: f32[8,1], index: 2, kind: input, shape index: {}]   ;;  %s1331_s3 = inlined_call_operand.vmem [shape: f32[8,1], index: 3, kind: input, shape index: {}]   ;;  %s1332_s4 = inlined_call_operand.hbm [shape: f32[2,4,8,128], index: 4, kind: output, shape index: {}]  }
   0x1   :  { %1349 = sst [smem:[#allocation21_spill]] %s1329_s1 }
   0x2   :  { %1350 = sst [smem:[#allocation22_spill]] %s1330_s2 }
   0x3   :  { %1351 = sst [smem:[#allocation23_spill]] %s1331_s3 }
   0x4   :  { %1352 = sst [smem:[#allocation24_spill]] %s1332_s4 }
   0x5   :  { %9 = vsyncpa [#allocation4], 0 }
   0x6   :  { %11 = vsyncpa [#allocation4 + $0x1], 0 }
   0x7   :  { %12 = vsyncpa [#allocation7], 0 }
   0x8   :  { %13 = vsyncpa [#allocation5], 0 }
   0x9   :  { %15 = vsyncpa [#allocation5 + $0x1], 0  ;;  %s1001_s15 = smov 0   ;;  %s1003_s16 = smov 0  }
   0xa   :  { %s1005_s17 = smov 0   ;;  %s1007_s18 = smov 0  }
   0xb   :  { %s1009_s19 = smov 0   ;;  %s1011_s20 = smov 0  }
   0xc   :  { %s1013_s21 = smov 0   ;;  %s1015_s22 = smov 0  }
   0xd   :  { %s1017_s23 = smov 0   ;;  %s1019_s24 = smov 0  }
   0xe   :  { %s1021_s25 = smov 0   ;;  %s1023_s26 = smov 0  }
   0xf   :  { %s1025_s27 = smov 0  }
  0x10 LB: > { %1353 = sst [smem:[#allocation12_spill]] %s910_s15  ;;  %s577_s28 = sadd.s32 4294967295, %s958_s27   ;;  %s958_s27 = sphi %s1025_s27, %s21_s27   ;;  %s954_s26 = sphi %s1023_s26, %s1400_s26   ;;  %s950_s25 = sphi %s1021_s25, %s1399_s25   ;;  %s946_s24 = sphi %s1019_s24, %s1389_s24   ;;  %s942_s23 = sphi %s1017_s23, %s1398_s23   ;;  %s938_s22 = sphi %s1015_s22, %s1388_s22   ;;  %s934_s21 = sphi %s1013_s21, %s1387_s21   ;;  %s930_s20 = sphi %s1011_s20, %s1397_s20   ;;  %s926_s19 = sphi %s1009_s19, %s1396_s19   ;;  %s922_s18 = sphi %s1007_s18, %s1395_s18   ;;  %s918_s17 = sphi %s1005_s17, %s1394_s17   ;;  %s914_s16 = sphi %s1003_s16, %s1393_s16   ;;  %s910_s15 = sphi %s1001_s15, %s1392_s15  }
  0x11   : > { %1354 = sst [smem:[#allocation13_spill]] %s938_s22  ;;  %s578_s29 = sadd.s32 4294967294, %s958_s27  }
  0x12   : > { %1355 = sst [smem:[#allocation14_spill]] %s942_s23  ;;  %p64_p0 = scmp.ne.s32.totalorder %s926_s19, %s922_s18 }
  0x13   : > { %1356 = sst [smem:[#allocation15_spill]] %s946_s24  ;;  %p1067_p1 = scmp.eq.s32.totalorder %s577_s28, 0 }
  0x14   : > { %1357 = sst [smem:[#allocation16_spill]] %s950_s25  ;;  %p152_p2 = scmp.ne.s32.totalorder %s918_s17, %s914_s16 }
  0x15   : > { %s1358_s30 = scalar_select %p1067_p1, 1, 0 }
  0x16   : > { %p153_p3 = scmp.eq.s32.totalorder %s577_s28, 23  ;;  %p1075_p4 = por %p1067_p1, %p64_p0 }
  0x17   : > { %p158_p5 = scmp.ne.s32.totalorder %s914_s16, %s910_s15  ;;  %p159_p7 = scmp.eq.s32.totalorder %s578_s29, 23 }
  0x18   : > { %s1359_s5 = scalar_select %p1075_p4, 1, 0 }
  0x19   : > { %p1081_p6 = por %p153_p3, %p152_p2  ;;  %p579_p8 = scmp.ge.s32.totalorder %s958_s27, 1 }
  0x1a   : > { %p166_p9 = scmp.lt.s32.totalorder %s958_s27, 25  ;;  %p1087_p10 = por %p159_p7, %p158_p5 }
  0x1b   : > { %s1360_s6 = scalar_select %p1081_p6, 1, 0 }
  0x1c   : > { %s1362_s7 = scalar_select %p1087_p10, 1, 0 }
  0x1d   : > { %1361 = sst [smem:[#allocation17_spill]] %s1360_s6  ;;  %p1091_p11 = pnand %p579_p8, %p166_p9 }
  0x1e   : > { %1363 = sst [smem:[#allocation18_spill]] %s1362_s7  ;;  %s960_s9 = smov [#allocation6]  }
  0x1f   : > { %s1364_s8 = scalar_select %p1091_p11, 1, 0 }
  0x20   : > { %s178_s10 = sshll.u32 %s960_s9, 4  ;;  %p620_p12 = pneg %p1091_p11  ;;  %s179_s10 = int_to_ptr.vmem [resolvable:$true] %s178_s10 }
  0x21   : > { %s1366_s1 = sld [smem:[#allocation21_spill]] }
  0x22   : > { %p1099_p13 = pnand %p620_p12, %p1067_p1 }
  0x24   : > { %p760_p2 = pneg %p1099_p13 }
  0x27   : > { %s758_s14 = scalar_lea.hbm %s1366_s1, 384 }
  0x28   : > { %p759_p0 = scmp.ne.s32.totalorder %s1366_s1, %s758_s14  ;;  %p765_p7 = scmp.lt.u32.totalorder %s758_s14, %s1366_s1 }
  0x2a   : > { %p761_p3 = pnand %p760_p2, %p759_p0 }
  0x2c   : > { %p762_p5 = pneg %p761_p3 }
  0x2e   : > { %p767_p8 = pnand %p765_p7, %p762_p5 }
  0x30   : > { %770 = shalt.err (!%p767_p8)
}
  0x31   : > { %s771_s7 = scalar_lea.vmem %s179_s10, 384  ;;  %p779_p6 = scmp.lt.s32.totalorder %s179_s10, %s179_s10 }
  0x32   : > { %p772_p9 = scmp.ne.s32.totalorder %s179_s10, %s771_s7  ;;  %p780_p1 = scmp.lt.s32.totalorder %s771_s7, %s771_s7 }
  0x34   : > { %p774_p12 = pnand %p772_p9, %p760_p2  ;;  %p781_p4 = por %p780_p1, %p779_p6 }
  0x36   : > { %p775_p10 = pneg %p774_p12 }
  0x38   : > { %p782_p11 = pnand %p781_p4, %p775_p10 }
  0x3a   : > { %785 = shalt.err (!%p782_p11)
}
  0x3b   : > { %s1340_s12 = smov 128   ;;  %s1341_s13 = smov 8  }
  0x3c   : > { %623 = dma.hbm_to_vmem [thread:$0]  (!%p1099_p13), %s1366_s1, 384, %s179_s10, [#allocation7], %s1340_s12, %s1340_s12, %s1341_s13  }
  0x3d   : > { %s33_s18 = sadd.s32 1, %s946_s24  ;;  %s36_s28 = sadd.s32 1, %s950_s25 }
  0x3e   : > { %p34_p1 = scmp.ge.s32.totalorder %s33_s18, 3  ;;  %s40_s29 = sadd.s32 1, %s954_s26 }
  0x3f   : > { %s1127_s9 = sadd.s32 %s946_s24, %s950_s25  ;;  %s51_s15 = sadd.s32 1, %s930_s20 }
  0x40   : > { %s1402_s18 = smov (%p34_p1, %s33_s18), 0  ;;  %s1404_s28 = smov (!%p34_p1, %s36_s28), %s950_s25 }
  0x41   : > { %1367 = sst [smem:[#allocation19_spill]] %s1402_s18  ;;  %p58_p4 = scmp.ne.s32.totalorder %s930_s20, %s926_s19 }
  0x42   : > { %p59_p6 = scmp.eq.s32.totalorder %s958_s27, 0  ;;  %p38_p10 = scmp.ge.s32.totalorder %s1404_s28, 4 }
  0x43   : > { %s142_s10 = sadd.s32 1, %s918_s17  ;;  %p633_p13 = scmp.lt.s32.totalorder %s958_s27, 24 }
  0x44   : > { %p1137_p11 = por %p59_p6, %p58_p4  ;;  %s1406_s28 = smov (%p38_p10, %s1404_s28), 0 }
  0x45   : > { %1369 = sst [smem:[#allocation20_spill]] %s1406_s28  ;;  %s1408_s29 = smov (!%p38_p10, %s40_s29), %s954_s26 }
  0x46   : > { %s45_s7 = sadd.s32 %s1406_s28, %s1402_s18  ;;  %s138_s14 = ssub.s32 %s950_s25, %s1406_s28 }
  0x47   : > { %p42_p0 = scmp.ge.s32.totalorder %s1408_s29, 2  ;;  %s47_s12 = ssub.s32 %s1127_s9, %s45_s7 }
  0x48   : > { %s198_s13 = sand.u32 1, %s930_s20   ;;  %s583_s1 = sshll.u32 %s1127_s9, 2 }
  0x49   : > { %s1410_s29 = smov (%p42_p0, %s1408_s29), 0  ;;  %s582_s24 = sshll.u32 %s198_s13, 4 }
  0x4a   : > { %s46_s4 = ssub.s32 %s954_s26, %s1410_s29  ;;  %s611_s23 = smul.u32 24, %s954_s26 }
  0x4b   : > { %s48_s6 = sor.u32 %s47_s12, %s46_s4  ;;  %s139_s22 = sor.u32 %s138_s14, %s46_s4 }
  0x4c   : > { %p49_p2 = scmp.eq.s32.totalorder %s48_s6, 0  ;;  %p140_p3 = scmp.eq.s32.totalorder %s139_s22, 0 }
  0x4d   : > { %s202_s18 = scalar_lea.vmem [#allocation3], %s582_s24  ;;  %s209_s7 = sadd.s32 %s611_s23, %s583_s1 }
  0x4e   : > { %s212_s3 = sshll.u32 %s202_s18, 4  ;;  %s584_s9 = sshll.u32 %s209_s7, 6  ;;  %s1163_s3 = int_to_ptr.vmem [resolvable:$true] %s212_s3 }
  0x4f   : > { %s1158_s28 = scalar_select %p49_p2, %s930_s20, %s51_s15  }
  0x50   : > { %s1161_s25 = scalar_select %p140_p3, %s918_s17, %s142_s10  }
  0x51   : > { %p1169_p5 = pnand %p633_p13, %p1137_p11  ;;  %s1176_s22 = scalar_lea.hbm %s1328_s0, %s584_s9 }
  0x52   : > { %s1178_s1 = scalar_lea.sflag [#allocation4], %s198_s13  ;;  %s786_s15 = scalar_lea.hbm %s1176_s22, 256 }
  0x53   : > { %p787_p7 = scmp.ne.s32.totalorder %s1176_s22, %s786_s15  ;;  %p788_p8 = pneg %p1169_p5 }
  0x54   : > { %s791_s12 = scalar_lea.hbm %s1328_s0, 3072  ;;  %p792_p1 = scmp.lt.u32.totalorder %s1176_s22, %s1328_s0 }
  0x55   : > { %p789_p9 = pnand %p788_p8, %p787_p7  ;;  %p793_p4 = scmp.lt.u32.totalorder %s791_s12, %s786_s15 }
  0x56   : > { %p795_p10 = scmp.lt.u32.totalorder %s786_s15, %s1176_s22 }
  0x57   : > { %p790_p12 = pneg %p789_p9  ;;  %p794_p6 = por %p793_p4, %p792_p1 }
  0x59   : > { %p796_p11 = por %p795_p10, %p794_p6 }
  0x5b   : > { %p797_p13 = pnand %p796_p11, %p790_p12 }
  0x5d   : > { %800 = shalt.err (!%p797_p13)
}
  0x5e   : > { %s801_s13 = scalar_lea.vmem %s1163_s3, 256  ;;  %s963_s11 = smov [#allocation3]  }
  0x5f   : > { %p802_p0 = scmp.ne.s32.totalorder %s1163_s3, %s801_s13  ;;  %s806_s14 = sshll.u32 %s963_s11, 4  ;;  %s807_s14 = int_to_ptr.vmem [resolvable:$false] %s806_s14 }
  0x60   : > { %s808_s7 = scalar_lea.vmem %s807_s14, 512  ;;  %p809_p7 = scmp.lt.s32.totalorder %s1163_s3, %s807_s14 }
  0x61   : > { %p804_p2 = pnand %p802_p0, %p788_p8  ;;  %p810_p9 = scmp.lt.s32.totalorder %s808_s7, %s801_s13 }
  0x63   : > { %p805_p3 = pneg %p804_p2  ;;  %p811_p1 = por %p810_p9, %p809_p7 }
  0x65   : > { %p812_p4 = pnand %p811_p1, %p805_p3 }
  0x67   : > { %815 = shalt.err (!%p812_p4)
}
  0x68   : > { %s1371_s9 = smov 8   ;;  %s1372_s4 = smov 128  }
  0x69   : > { %627 = dma.hbm_to_vmem [thread:$0]  (!%p1169_p5), %s1176_s22, 256, %s1163_s3, %s1178_s1, %s1372_s4, %s1372_s4, %s1371_s9  }
  0x6a   : > { %p1373_p8 = scmp.ne.s32.totalorder %s1364_s8, 0 }
  0x6b   : > { %s226_s6 = sand.u32 (!%p1373_p8), 1, %s926_s19   ;;  %p1374_p12 = scmp.ne.s32.totalorder (!%p1373_p8), %s1359_s5, 0 }
  0x6c   : > { %224 = sbr.rel (%p1373_p8) target bundleno = 541 (0x21d), region = 36  ;;  %s586_s15 = sshll.u32 (!%p1373_p8), %s226_s6, 4 }
  0x6d   : > { %s227_s23 = scalar_lea.sflag (!%p1373_p8), [#allocation4], %s226_s6  ;;  %s230_s24 = scalar_lea.vmem (!%p1373_p8), [#allocation3], %s586_s15 }
  0x73   : > { %897 = dma.done.wait (%p1374_p12), %s227_s23, 256  }
  0x74   : > { %899 = vsyncadd (%p1374_p12), %s227_s23, 4294967040  ;;  %p1375_p6 = scmp.ne.s32.totalorder %s1358_s30, 0 }
  0x76   : > { %901 = dma.done.wait (%p1375_p6), [#allocation7], 384  }
  0x77   : > { %903 = vsyncadd (%p1375_p6), [#allocation7], 4294966912  ;;  %s256_s2 = sand.u32 1, %s914_s16   ;;  %p589_p5 = scmp.ne.s32.totalorder %s934_s21, 0 }
  0x78   : > { %s1223_s3 = sshll.u32 %s256_s2, 3  ;;  %v964_v0 = vmov (!%p589_p5), 0.0  }
  0x79   : > { %s258_s8 = scalar_lea.vmem [#allocation8], %s1223_s3  ;;  %264 = sbr.rel (%p589_p5) target bundleno = 128 (0x80), region = 48  ;;  %265 = vst [vmem:[#allocation2] sm:$0xff] (!%p589_p5), %v964_v0 }
  0x80 PF: > { %v266_v1 = vld [vmem:[%s230_s24] sm:$0xff]  ;;  %v267_v2 = vld [vmem:[%s230_s24 + $0x8] sm:$0xff]  ;;  %s965_s5 = smov 126   ;;  %s966_s30 = smov 127   ;;  %v967_v4 = vmov 0   ;;  %vm389_vm0 = vcmask 130048  }
  0x81   : > { %279 = vrot.lane.b32.xlu1 %v266_v1, %s965_s5  ;;  %270 = vrot.lane.b32.xlu0 %v266_v1, %s966_s30  ;;  %v594_v3 = vcombine.low %v266_v1, %v267_v2  ;;  %s968_s22 = smov 118   ;;  %s969_s1 = smov 117   ;;  %vm276_vm1 = vcmask 1039360   ;;  %vm285_vm2 = vcmask 1031168   ;;  %vm294_vm3 = vcmask 965632   ;;  %v346_v0 = vld [vmem:[#allocation2] sm:$0xff] }
  0x82   : > { %393 = vmatprep.subr.bf16.mxu0 %v967_v4  ;;  %s970_s12 = smov 116   ;;  %s971_s18 = smov 108   ;;  %vm303_vm4 = vcmask 957440   ;;  %vm312_vm5 = vcmask 949248   ;;  %vm321_vm6 = vcmask 883712   ;;  %vm330_vm7 = vcmask 875520  }
  0x83   : > { %394 = vmatpush1.bf16.msra.mxu0 %v594_v3  ;;  %s610_s10 = sshll.u32 %s934_s21, 3  ;;  %s972_s11 = smov 107   ;;  %vm339_vm8 = vcmask 867328  }
  0x84   : > { %395 = vmatprep.subr.bf16.mxu0 %v967_v4  ;;  %s344_s13 = scalar_lea.vmem [#allocation6], %s610_s10  ;;  %s973_s14 = smov 106  }
  0x85   : > { %281 = vrot.lane.b32.xlu1 %v267_v2, %s965_s5  ;;  %272 = vrot.lane.b32.xlu0 %v267_v2, %s966_s30  ;;  %v1230_v5 = vld [vmem:[%s344_s13] sm:$0xff]  ;;  %p604_p10 = scmp.ne.s32.totalorder %s934_s21, 2 }
  0x86   : > { %v593_v6 = vcombine.high %v1230_v5, %v1230_v5  ;;  %v592_v63 = vcombine.low %v1230_v5, %v1230_v5  ;;  %s1376_s4 = sld [smem:[#allocation22_spill]] (!%p604_p10)  ;;  %s1377_s23 = sld [smem:[#allocation23_spill]] (!%p604_p10) }
  0x88   : > { %603 = vmatprep.mubr.msk.bf16.mxu0 %vm389_vm0, %v593_v6 }
  0x89   : > { %290 = vrot.lane.b32.xlu1 %v267_v2, %s968_s22  ;;  %288 = vrot.lane.b32.xlu0 %v266_v1, %s968_s22 }
  0x8c   : > { %v447_v5 = vld [vmem:[%s1377_s23] sm:$0xff] (!%p604_p10) }
  0x8d   : > { %299 = vrot.lane.b32.xlu1 %v267_v2, %s969_s1  ;;  %297 = vrot.lane.b32.xlu0 %v266_v1, %s969_s1 }
  0x91   : > { %308 = vrot.lane.b32.xlu1 %v267_v2, %s970_s12  ;;  %306 = vrot.lane.b32.xlu0 %v266_v1, %s970_s12 }
  0x95   : > { %317 = vrot.lane.b32.xlu1 %v267_v2, %s971_s18  ;;  %315 = vrot.lane.b32.xlu0 %v266_v1, %s971_s18 }
  0x99   : > { %326 = vrot.lane.b32.xlu1 %v267_v2, %s972_s11  ;;  %324 = vrot.lane.b32.xlu0 %v266_v1, %s972_s11 }
  0x9d   : > { %335 = vrot.lane.b32.xlu1 %v267_v2, %s973_s14  ;;  %333 = vrot.lane.b32.xlu0 %v266_v1, %s973_s14 }
  0xf3   : > { %v280_v7 = vpop.permute.xlu1 %279  ;;  %v271_v8 = vpop.permute.xlu0 %270 }
  0xf4   : > { %v274_v9 = vrot.slane %v271_v8, 4  ;;  %v283_v14 = vrot.slane %v280_v7, 4 }
  0xf6   : > { %v277_v15 = vsel %vm276_vm1, %v271_v8, %v274_v9  ;;  %v286_v23 = vsel %vm285_vm2, %v280_v7, %v283_v14  ;;  %v974_v8 = vmov (!%p604_p10), 0  }
  0xf7   : > { %v282_v10 = vpop.permute.xlu1 %281  ;;  %v273_v11 = vpop.permute.xlu0 %272  ;;  %757 = vset.pattern.permute.xlu0 (!%p604_p10), %v974_v8 }
  0xf8   : > { %v284_v12 = vrot.slane %v282_v10, 4  ;;  %v275_v13 = vrot.slane %v273_v11, 4 }
  0xfa   : > { %v278_v16 = vsel %vm276_vm1, %v273_v11, %v275_v13  ;;  %v287_v20 = vsel %vm285_vm2, %v282_v10, %v284_v12 }
  0xfb   : > { %v595_v17 = vcombine.low %v277_v15, %v278_v16  ;;  %v291_v18 = vpop.permute.xlu1 %290  ;;  %v289_v19 = vpop.permute.xlu0 %288  ;;  %v596_v24 = vcombine.low %v286_v23, %v287_v20 }
  0xfc   : > { %v293_v21 = vrot.slane %v291_v18, 4  ;;  %v292_v22 = vrot.slane %v289_v19, 4 }
  0xfd   : > { %396 = vmatpush1.bf16.msra.mxu0 %v595_v17 }
  0xfe   : > { %397 = vmatprep.subr.bf16.mxu0 %v967_v4  ;;  %v296_v27 = vsel %vm294_vm3, %v291_v18, %v293_v21  ;;  %v295_v28 = vsel %vm294_vm3, %v289_v19, %v292_v22 }
  0xff   : > { %v300_v25 = vpop.permute.xlu1 %299  ;;  %v298_v26 = vpop.permute.xlu0 %297  ;;  %v597_v31 = vcombine.low %v295_v28, %v296_v27 }
 0x100   : > { %v302_v29 = vrot.slane %v300_v25, 4  ;;  %v301_v30 = vrot.slane %v298_v26, 4 }
 0x101   : > { %398 = vmatpush1.bf16.msra.mxu0 %v596_v24 }
 0x102   : > { %399 = vmatprep.subr.bf16.mxu0 %v967_v4  ;;  %v305_v34 = vsel %vm303_vm4, %v300_v25, %v302_v29  ;;  %v304_v35 = vsel %vm303_vm4, %v298_v26, %v301_v30 }
 0x103   : > { %v309_v32 = vpop.permute.xlu1 %308  ;;  %v307_v33 = vpop.permute.xlu0 %306  ;;  %v598_v38 = vcombine.low %v304_v35, %v305_v34 }
 0x104   : > { %v311_v36 = vrot.slane %v309_v32, 4  ;;  %v310_v37 = vrot.slane %v307_v33, 4 }
 0x105   : > { %400 = vmatpush1.bf16.msra.mxu0 %v597_v31 }
 0x106   : > { %401 = vmatprep.subr.bf16.mxu0 %v967_v4  ;;  %v314_v41 = vsel %vm312_vm5, %v309_v32, %v311_v36  ;;  %v313_v42 = vsel %vm312_vm5, %v307_v33, %v310_v37 }
 0x107   : > { %v318_v39 = vpop.permute.xlu1 %317  ;;  %v316_v40 = vpop.permute.xlu0 %315  ;;  %v599_v45 = vcombine.low %v313_v42, %v314_v41 }
 0x108   : > { %v320_v43 = vrot.slane %v318_v39, 4  ;;  %v319_v44 = vrot.slane %v316_v40, 4 }
 0x109   : > { %402 = vmatpush1.bf16.msra.mxu0 %v598_v38 }
 0x10a   : > { %403 = vmatprep.subr.bf16.mxu0 %v967_v4  ;;  %v323_v48 = vsel %vm321_vm6, %v318_v39, %v320_v43  ;;  %v322_v49 = vsel %vm321_vm6, %v316_v40, %v319_v44 }
 0x10b   : > { %v327_v46 = vpop.permute.xlu1 %326  ;;  %v325_v47 = vpop.permute.xlu0 %324  ;;  %v600_v52 = vcombine.low %v322_v49, %v323_v48 }
 0x10c   : > { %v329_v50 = vrot.slane %v327_v46, 4  ;;  %v328_v51 = vrot.slane %v325_v47, 4 }
 0x10d   : > { %404 = vmatpush1.bf16.msra.mxu0 %v599_v45 }
 0x10e   : > { %405 = vmatprep.subr.bf16.mxu0 %v967_v4  ;;  %v332_v55 = vsel %vm330_vm7, %v327_v46, %v329_v50  ;;  %v331_v56 = vsel %vm330_vm7, %v325_v47, %v328_v51 }
 0x10f   : > { %v336_v53 = vpop.permute.xlu1 %335  ;;  %v334_v54 = vpop.permute.xlu0 %333  ;;  %v601_v59 = vcombine.low %v331_v56, %v332_v55 }
 0x110   : > { %v338_v57 = vrot.slane %v336_v53, 4  ;;  %v337_v58 = vrot.slane %v334_v54, 4 }
 0x111   : > { %406 = vmatpush1.bf16.msra.mxu0 %v600_v52 }
 0x112   : > { %407 = vmatprep.subr.bf16.mxu0 %v967_v4  ;;  %v341_v60 = vsel %vm339_vm8, %v336_v53, %v338_v57  ;;  %v340_v61 = vsel %vm339_vm8, %v334_v54, %v337_v58 }
 0x113   : > { %v602_v62 = vcombine.low %v340_v61, %v341_v60 }
 0x115   : > { %408 = vmatpush1.bf16.msra.mxu0 %v601_v59 }
 0x116   : > { %409 = vmatprep.subr.bf16.mxu0 %v967_v4  ;;  %v440_v4 = vld [vmem:[%s1376_s4] sm:$0xff] (!%p604_p10) }
 0x117   : > { %443 = vperm.xlu0 (!%p604_p10), %757, %v440_v4  }
 0x119   : > { %410 = vmatpush1.bf16.msra.mxu0 %v602_v62 }
 0x11b   : > { %450 = vperm.xlu0 (!%p604_p10), %757, %v447_v5  }
 0x11c   : > { %426 = vmatmul.mubr.bf16.vlgmr.msra.gmra.mrb[0].mxu0 %v592_v63 }
 0x196   : > { %v444_v9 = vpop.permute.xlu0 (!%p604_p10), %443 }
 0x19a   : > { %v451_v12 = vpop.permute.xlu0 (!%p604_p10), %450 }
 0x1ec   : > { %438 = sbr.rel (%p604_p10) target bundleno = 513 (0x201), region = 52 }
 0x1ef   : > { %v427_v1 = vpop.f32.mrb[0].mxu0 }
 0x1f0   : > { %v433_v2 = vadd.f32 %v427_v1, %v346_v0  ;;  %v429_v3 = vpop.f32.mrb[1].mxu0 }
 0x1f1   : > { %v430_v6 = vpop.f32.mrb[2].mxu0 }
 0x1f2   : > { %434 = vst [vmem:[#allocation2] sm:$0xff] %v433_v2  ;;  %v431_v7 = vpop.f32.mrb[3].mxu0 }
 0x1f9   : > { %v439_v10 = vld [vmem:[#allocation2] sm:$0xff] }
 0x1fa   : > { %v446_v11 = vmul.f32 %v444_v9, %v439_v10 }
 0x1fc   : > { %v453_v13 = vadd.f32 %v451_v12, %v446_v11 }
 0x1fe   : > { %v454_v14 = vmax.f32 %v453_v13, 0.0 }
 0x200   : > { %455 = vst [vmem:[%s258_s8] sm:$0xff] %v454_v14 }
 0x201 PF: > { %s1378_s21 = sld [smem:[#allocation14_spill]]  ;;  %s1379_s24 = sld [smem:[#allocation13_spill]] }
 0x202   : > { %s1380_s5 = sld [smem:[#allocation17_spill]]  ;;  %s472_s1 = sshll.u32 %s258_s8, 4  ;;  %s1256_s1 = int_to_ptr.vmem [resolvable:$true] %s472_s1 }
 0x203   : > { %s1381_s13 = sld [smem:[#allocation24_spill]]  ;;  %s457_s14 = scalar_lea.sflag [#allocation5], %s256_s2 }
 0x204   : > { %s816_s7 = scalar_lea.vmem %s1256_s1, 128  ;;  %s975_s9 = smov [#allocation8]  }
 0x205   : > { %p817_p11 = scmp.ne.s32.totalorder %s1256_s1, %s816_s7  ;;  %s820_s3 = sshll.u32 %s975_s9, 4  ;;  %s821_s3 = int_to_ptr.vmem [resolvable:$false] %s820_s3 }
 0x206   : > { %s822_s8 = scalar_lea.vmem %s821_s3, 256  ;;  %p823_p3 = scmp.lt.s32.totalorder %s1256_s1, %s821_s3 }
 0x207   : > { %s606_s30 = sshll.u32 %s1378_s21, 2  ;;  %p824_p7 = scmp.lt.s32.totalorder %s822_s8, %s816_s7 }
 0x208   : > { %s468_s22 = sadd.s32 %s1379_s24, %s606_s30  ;;  %p1382_p13 = scmp.ne.s32.totalorder %s1380_s5, 0 }
 0x209   : > { %s607_s12 = sshll.u32 %s468_s22, 7  ;;  %p825_p9 = por %p824_p7, %p823_p3 }
 0x20a   : > { %s470_s11 = scalar_lea.hbm %s1381_s13, %s607_s12  ;;  %p818_p0 = pnand %p817_p11, %p1382_p13 }
 0x20c   : > { %p819_p2 = pneg %p818_p0 }
 0x20e   : > { %p826_p1 = pnand %p825_p9, %p819_p2 }
 0x210   : > { %829 = shalt.err (!%p826_p1)
}
 0x211   : > { %s830_s4 = scalar_lea.hbm %s470_s11, 128  ;;  %s834_s15 = scalar_lea.hbm %s1381_s13, 1024 }
 0x212   : > { %p831_p4 = scmp.ne.s32.totalorder %s470_s11, %s830_s4  ;;  %p835_p6 = scmp.lt.u32.totalorder %s470_s11, %s1381_s13 }
 0x213   : > { %p836_p5 = scmp.lt.u32.totalorder %s834_s15, %s830_s4  ;;  %p838_p11 = scmp.lt.u32.totalorder %s830_s4, %s470_s11 }
 0x214   : > { %p832_p8 = pnand %p831_p4, %p1382_p13 }
 0x215   : > { %p837_p10 = por %p836_p5, %p835_p6 }
 0x216   : > { %p833_p12 = pneg %p832_p8 }
 0x217   : > { %p839_p0 = por %p838_p11, %p837_p10 }
 0x219   : > { %p840_p2 = pnand %p839_p0, %p833_p12 }
 0x21b   : > { %843 = shalt.err (!%p840_p2)
}
 0x21c   : > { %618 = dma.vmem_to_hbm [thread:$0]  (%p1382_p13), %s1256_s1, 128, %s470_s11, %s457_s14  }
 0x21d PF: > { %s1383_s24 = sld [smem:[#allocation12_spill]]  ;;  %s1384_s30 = sld [smem:[#allocation18_spill]] }
 0x21e   : > { %p635_p3 = scmp.ge.s32.totalorder %s958_s27, 2 }
 0x223   : > { %s484_s22 = sand.u32 1, %s1383_s24   ;;  %p1385_p7 = scmp.ne.s32.totalorder %s1384_s30, 0 }
 0x224   : > { %s485_s12 = scalar_lea.sflag [#allocation5], %s484_s22 }
 0x225   : > { %p629_p9 = pnand %p635_p3, %p1385_p7 }
 0x227   : > { %905 = dma.done.wait (!%p629_p9), %s485_s12, 128  }
 0x228   : > { %907 = vsyncadd (!%p629_p9), %s485_s12, 4294967168  ;;  %s21_s27 = sadd.s32 1, %s958_s27   ;;  %s1387_s21 = sld [smem:[#allocation15_spill]] }
 0x229   : > { %p1284_p1 = scmp.ge.s32.totalorder %s21_s27, 26   ;;  %s1388_s22 = sld [smem:[#allocation16_spill]] }
 0x22a   : > { %s1389_s24 = sld [smem:[#allocation19_spill]]  ;;  %s1390_s5 = sld [smem:[#allocation20_spill]] }
 0x22b   : > { %s1392_s15 = smov %s914_s16  ;;  %s1393_s16 = smov %s918_s17 }
 0x22c   : > { %s1394_s17 = smov %s1161_s25  ;;  %s1395_s18 = smov %s926_s19 }
 0x22d   : > { %s1396_s19 = smov %s930_s20  ;;  %s1397_s20 = smov %s1158_s28 }
 0x22e   : > { %s1398_s23 = smov %s954_s26  ;;  %s1400_s26 = smov %s1410_s29 }
 0x22f   :  { %20 = sbr.rel (!%p1284_p1) target bundleno = 16 (0x10), region = 94 }
 0x230   : > { %s1399_s25 = smov %s1390_s5 }
 0x236   :  { %490 = vsyncpa [#allocation4], 1 }
 0x237   :  { %492 = vsyncpa [#allocation4 + $0x1], 1 }
 0x238   :  { %493 = vsyncpa [#allocation7], 1 }
 0x239   :  { %494 = vsyncpa [#allocation5], 1 }
 0x23a   :  { %496 = vsyncpa [#allocation5 + $0x1], 1 }

</bundles_post_ra>
